<compile_context>
chip_gen: v6e
topology: v6e:2x2x1
jax: 0.10.0
libtpu: 0.0.40
codegen_flags: <defaults>
</compile_context>

<pallas_src>
import jax
import jax.numpy as jnp
from jax import lax
from jax.experimental import pallas as pl
from jax.experimental.pallas import tpu as pltpu


def _encoder_kernel(x_ref, w_ih_ref, w_hh_ref, b_ref, ctx_ref,
                    repres_ref, alpha_ref):
    """LSTM recurrence + attention in one kernel (no grid, no scratch).

    x_ref:    (T*B, D)  bf16   input sequence, flattened time-major
    w_ih_ref: (D, 4H)   bf16   LSTM input weights, pre-transposed, (i,f,o,g)
    w_hh_ref: (H, 4H)   bf16   LSTM recurrent weights, pre-transposed, (i,f,o,g)
    b_ref:    (1, 4H)   f32    combined bias (b_ih + b_hh), (i,f,o,g)
    ctx_ref:  (1, H)    f32    attention context vector (row layout)
    repres_ref: (B, H)  f32    attended representation (output)
    alpha_ref:  (B, T)  f32    attention weights       (output)
    """
    B, T = alpha_ref.shape
    H = repres_ref.shape[1]

    # Hoisted input projection: one lane-dense bf16 MXU op + f32 bias add.
    xp = jnp.dot(x_ref[...], w_ih_ref[...],
                 preferred_element_type=jnp.float32) + b_ref[...]   # (T*B, 4H) f32

    w_hh = w_hh_ref[...]          # (H, 4H) bf16, pre-transposed in wrapper
    ctx_row = ctx_ref[...]        # (1, H)  f32

    def fast_sigmoid(z):
        # sigmoid(z) == 0.5 * (1 + tanh(0.5*z)): one EUP launch (tanh) plus
        # cheap VPU scale/shift, instead of exp + dependent reciprocal.
        return 0.5 * (jnp.tanh(0.5 * z) + 1.0)

    h = jnp.zeros((B, H), jnp.float32)
    c = jnp.zeros((B, H), jnp.float32)
    hs = []
    scores = []
    # T is tiny and static: full unroll; per-step slices of xp are static.
    for t in range(T):
        gates = xp[t * B:(t + 1) * B, :] + jnp.dot(
            h.astype(w_hh.dtype), w_hh,
            preferred_element_type=jnp.float32)                     # (B, 4H) f32
        # gate order (i, f, o, g): one fused sigmoid over 3H + one tanh over H
        sg = fast_sigmoid(gates[:, :3 * H])
        g_g = jnp.tanh(gates[:, 3 * H:])
        i_g = sg[:, 0 * H:1 * H]
        f_g = sg[:, 1 * H:2 * H]
        o_g = sg[:, 2 * H:3 * H]
        c = f_g * c + i_g * g_g
        h = o_g * jnp.tanh(c)
        hs.append(h)
        # Fused attention score: lane reduce rides the otherwise-idle XLU slot.
        scores.append(jnp.sum(h * ctx_row, axis=-1, keepdims=True))  # (B, 1)

    # Epilogue: softmax over time + weighted sum of hidden states.
    scores_bt = jnp.concatenate(scores, axis=1)                      # (B, T)
    m = jnp.max(scores_bt, axis=1, keepdims=True)
    e = jnp.exp(scores_bt - m)
    alpha = e / jnp.sum(e, axis=1, keepdims=True)                    # (B, T)
    alpha_ref[...] = alpha

    rep = alpha[:, 0:1] * hs[0]
    for t in range(1, T):
        rep = rep + alpha[:, t:t + 1] * hs[t]
    repres_ref[...] = rep                                            # (B, H)


@jax.jit
def recurrent_encoder_forward(x, w_ih, w_hh, b_ih, b_hh, ctx):
    """x: (T, B, D); weights in PyTorch LSTM layout / gate order (i, f, g, o)."""
    T, B, D = x.shape
    H = w_hh.shape[1]

    # Reorder torch gate blocks (i, f, g, o) -> (i, f, o, g) so the kernel can
    # apply one sigmoid over the first 3H columns and one tanh over the last H.
    def reorder(w):
        w4 = w.reshape(4, H, -1) if w.ndim == 2 else w.reshape(4, H)
        return jnp.concatenate([w4[0], w4[1], w4[3], w4[2]], axis=0)

    # bf16 operands for the MXU; accumulation stays f32 inside the kernel.
    w_ih_t = reorder(w_ih).T.astype(jnp.bfloat16)          # (D, 4H)
    w_hh_t = reorder(w_hh).T.astype(jnp.bfloat16)          # (H, 4H)
    bias = reorder(b_ih + b_hh).reshape(1, 4 * H).astype(jnp.float32)  # (1, 4H)
    ctx_row = ctx.reshape(1, H).astype(jnp.float32)        # (1, H)
    x2d = x.reshape(T * B, D).astype(jnp.bfloat16)         # (T*B, D)

    vmem = pl.BlockSpec(memory_space=pltpu.MemorySpace.VMEM)
    repres, alpha = pl.pallas_call(
        _encoder_kernel,
        out_shape=(jax.ShapeDtypeStruct((B, H), jnp.float32),
                   jax.ShapeDtypeStruct((B, T), jnp.float32)),
        in_specs=[vmem, vmem, vmem, vmem, vmem],
        out_specs=(vmem, vmem),
    )(x2d, w_ih_t, w_hh_t, bias, ctx_row)
    # Lane-dense (B, H) store in-kernel; add the size-1 dim outside.
    return repres.reshape(B, 1, H), alpha


def _reference(x, w_ih, w_hh, b_ih, b_hh, ctx):
    """Pure-JAX f32 reference mirroring the torch module (torch gate order)."""
    T, B, D = x.shape
    H = w_hh.shape[1]
    b = (b_ih + b_hh)[None, :]

    def step(carry, x_t):
        h, c = carry
        gates = x_t @ w_ih.T + h @ w_hh.T + b
        i = jax.nn.sigmoid(gates[:, 0 * H:1 * H])
        f = jax.nn.sigmoid(gates[:, 1 * H:2 * H])
        g = jnp.tanh(gates[:, 2 * H:3 * H])
        o = jax.nn.sigmoid(gates[:, 3 * H:4 * H])
        c = f * c + i * g
        h = o * jnp.tanh(c)
        return (h, c), h

    init = (jnp.zeros((B, H), jnp.float32), jnp.zeros((B, H), jnp.float32))
    _, outs = lax.scan(step, init, x)             # (T, B, H)
    iput = outs.transpose(1, 0, 2)                # (B, T, H)
    scores = (iput @ ctx)[..., 0]                 # (B, T)
    alpha = jax.nn.softmax(scores, axis=1)
    repres = jnp.einsum('bt,bth->bh', alpha, iput)[:, None, :]
    return repres, alpha


if __name__ == "__main__":
    # Small shapes consistent with the module's forward:
    #   n_bins (seq) T = 8, batch B = 2, ip_bin_size D = 4, bin_rnn_size H = 32
    T, B, D, H = 8, 2, 4, 32

    key = jax.random.PRNGKey(0)
    kx, k1, k2, k3, k4, k5 = jax.random.split(key, 6)

    scale = 1.0 / jnp.sqrt(H)
    x = jax.random.normal(kx, (T, B, D), dtype=jnp.float32)
    w_ih = jax.random.uniform(k1, (4 * H, D), jnp.float32, -scale, scale)
    w_hh = jax.random.uniform(k2, (4 * H, H), jnp.float32, -scale, scale)
    b_ih = jax.random.uniform(k3, (4 * H,), jnp.float32, -scale, scale)
    b_hh = jax.random.uniform(k4, (4 * H,), jnp.float32, -scale, scale)
    ctx = jax.random.uniform(k5, (H, 1), jnp.float32, -0.1, 0.1)

    hm_rep, bin_alpha = recurrent_encoder_forward(x, w_ih, w_hh, b_ih, b_hh, ctx)
    jax.block_until_ready((hm_rep, bin_alpha))

    ref_rep, ref_alpha = _reference(x, w_ih, w_hh, b_ih, b_hh, ctx)
    assert hm_rep.shape == (B, 1, H) and bin_alpha.shape == (B, T)
    # bf16 MXU operands: tolerance loosened vs. the f32 reference.
    assert jnp.allclose(hm_rep, ref_rep, atol=2e-2, rtol=2e-2)
    assert jnp.allclose(bin_alpha, ref_alpha, atol=2e-2, rtol=2e-2)

    print("KERNEL_OK")
</pallas_src>

<mosaic_0001>
module attributes {stable_mosaic.version = 11 : i64} {
  func.func @_encoder_kernel(%arg0: memref<16x4xbf16, #tpu.memory_space<vmem>>, %arg1: memref<4x128xbf16, #tpu.memory_space<vmem>>, %arg2: memref<32x128xbf16, #tpu.memory_space<vmem>>, %arg3: memref<1x128xf32, #tpu.memory_space<vmem>>, %arg4: memref<1x32xf32, #tpu.memory_space<vmem>>, %arg5: memref<2x32xf32, #tpu.memory_space<vmem>>, %arg6: memref<2x8xf32, #tpu.memory_space<vmem>>) attributes {dimension_semantics = [], scalar_prefetch = 0 : i64, scratch_operands = 0 : i64, tpu.core_type = #tpu.core_type<tc>} {
    %c0 = arith.constant 0 : index
    %c0_0 = arith.constant 0 : index
    %0 = vector.load %arg0[%c0, %c0_0] : memref<16x4xbf16, #tpu.memory_space<vmem>>, vector<16x4xbf16>
    %c0_1 = arith.constant 0 : index
    %c0_2 = arith.constant 0 : index
    %1 = vector.load %arg1[%c0_1, %c0_2] : memref<4x128xbf16, #tpu.memory_space<vmem>>, vector<4x128xbf16>
    %cst = arith.constant dense<0.000000e+00> : vector<16x128xf32>
    %2 = tpu.matmul %0, %1, %cst {dimension_numbers = #tpu.dot_dimension_numbers<[1], [0], [0], [1], [0, 0, 1, 1], [], []>} : vector<16x4xbf16>, vector<4x128xbf16>, vector<16x128xf32> -> vector<16x128xf32>
    %c0_3 = arith.constant 0 : index
    %c0_4 = arith.constant 0 : index
    %3 = vector.load %arg3[%c0_3, %c0_4] : memref<1x128xf32, #tpu.memory_space<vmem>>, vector<1x128xf32>
    %4 = vector.broadcast %3 : vector<1x128xf32> to vector<16x128xf32>
    %5 = arith.addf %2, %4 : vector<16x128xf32>
    %c0_5 = arith.constant 0 : index
    %c0_6 = arith.constant 0 : index
    %6 = vector.load %arg2[%c0_5, %c0_6] : memref<32x128xbf16, #tpu.memory_space<vmem>>, vector<32x128xbf16>
    %c0_7 = arith.constant 0 : index
    %c0_8 = arith.constant 0 : index
    %7 = vector.load %arg4[%c0_7, %c0_8] : memref<1x32xf32, #tpu.memory_space<vmem>>, vector<1x32xf32>
    %cst_9 = arith.constant 0.000000e+00 : f32
    %8 = vector.broadcast %cst_9 : f32 to vector<2x32xf32>
    %cst_10 = arith.constant 0.000000e+00 : f32
    %9 = vector.broadcast %cst_10 : f32 to vector<2x32xf32>
    %10 = vector.extract_strided_slice %5 {offsets = [0, 0], sizes = [2, 128], strides = [1, 1]} : vector<16x128xf32> to vector<2x128xf32>
    %11 = arith.truncf %8 : vector<2x32xf32> to vector<2x32xbf16>
    %cst_11 = arith.constant dense<0.000000e+00> : vector<2x128xf32>
    %12 = tpu.matmul %11, %6, %cst_11 {dimension_numbers = #tpu.dot_dimension_numbers<[1], [0], [0], [1], [0, 0, 1, 1], [], []>} : vector<2x32xbf16>, vector<32x128xbf16>, vector<2x128xf32> -> vector<2x128xf32>
    %13 = arith.addf %10, %12 : vector<2x128xf32>
    %14 = vector.extract_strided_slice %13 {offsets = [0, 0], sizes = [2, 96], strides = [1, 1]} : vector<2x128xf32> to vector<2x96xf32>
    %cst_12 = arith.constant 5.000000e-01 : f32
    %15 = vector.broadcast %cst_12 : f32 to vector<2x96xf32>
    %16 = arith.mulf %15, %14 : vector<2x96xf32>
    %17 = math.tanh %16 : vector<2x96xf32>
    %cst_13 = arith.constant 1.000000e+00 : f32
    %18 = vector.broadcast %cst_13 : f32 to vector<2x96xf32>
    %19 = arith.addf %17, %18 : vector<2x96xf32>
    %cst_14 = arith.constant 5.000000e-01 : f32
    %20 = vector.broadcast %cst_14 : f32 to vector<2x96xf32>
    %21 = arith.mulf %20, %19 : vector<2x96xf32>
    %22 = vector.extract_strided_slice %13 {offsets = [0, 96], sizes = [2, 32], strides = [1, 1]} : vector<2x128xf32> to vector<2x32xf32>
    %23 = math.tanh %22 : vector<2x32xf32>
    %24 = vector.extract_strided_slice %21 {offsets = [0, 0], sizes = [2, 32], strides = [1, 1]} : vector<2x96xf32> to vector<2x32xf32>
    %25 = vector.extract_strided_slice %21 {offsets = [0, 32], sizes = [2, 32], strides = [1, 1]} : vector<2x96xf32> to vector<2x32xf32>
    %26 = vector.extract_strided_slice %21 {offsets = [0, 64], sizes = [2, 32], strides = [1, 1]} : vector<2x96xf32> to vector<2x32xf32>
    %27 = arith.mulf %25, %9 : vector<2x32xf32>
    %28 = arith.mulf %24, %23 : vector<2x32xf32>
    %29 = arith.addf %27, %28 : vector<2x32xf32>
    %30 = math.tanh %29 : vector<2x32xf32>
    %31 = arith.mulf %26, %30 : vector<2x32xf32>
    %32 = vector.broadcast %7 : vector<1x32xf32> to vector<2x32xf32>
    %33 = arith.mulf %31, %32 : vector<2x32xf32>
    %cst_15 = arith.constant dense<0.000000e+00> : vector<2xf32>
    %34 = vector.multi_reduction <add>, %33, %cst_15 [1] : vector<2x32xf32> to vector<2xf32>
    %35 = vector.shape_cast %34 : vector<2xf32> to vector<2x1xf32>
    %36 = vector.extract_strided_slice %5 {offsets = [2, 0], sizes = [2, 128], strides = [1, 1]} : vector<16x128xf32> to vector<2x128xf32>
    %37 = arith.truncf %31 : vector<2x32xf32> to vector<2x32xbf16>
    %cst_16 = arith.constant dense<0.000000e+00> : vector<2x128xf32>
    %38 = tpu.matmul %37, %6, %cst_16 {dimension_numbers = #tpu.dot_dimension_numbers<[1], [0], [0], [1], [0, 0, 1, 1], [], []>} : vector<2x32xbf16>, vector<32x128xbf16>, vector<2x128xf32> -> vector<2x128xf32>
    %39 = arith.addf %36, %38 : vector<2x128xf32>
    %40 = vector.extract_strided_slice %39 {offsets = [0, 0], sizes = [2, 96], strides = [1, 1]} : vector<2x128xf32> to vector<2x96xf32>
    %cst_17 = arith.constant 5.000000e-01 : f32
    %41 = vector.broadcast %cst_17 : f32 to vector<2x96xf32>
    %42 = arith.mulf %41, %40 : vector<2x96xf32>
    %43 = math.tanh %42 : vector<2x96xf32>
    %cst_18 = arith.constant 1.000000e+00 : f32
    %44 = vector.broadcast %cst_18 : f32 to vector<2x96xf32>
    %45 = arith.addf %43, %44 : vector<2x96xf32>
    %cst_19 = arith.constant 5.000000e-01 : f32
    %46 = vector.broadcast %cst_19 : f32 to vector<2x96xf32>
    %47 = arith.mulf %46, %45 : vector<2x96xf32>
    %48 = vector.extract_strided_slice %39 {offsets = [0, 96], sizes = [2, 32], strides = [1, 1]} : vector<2x128xf32> to vector<2x32xf32>
    %49 = math.tanh %48 : vector<2x32xf32>
    %50 = vector.extract_strided_slice %47 {offsets = [0, 0], sizes = [2, 32], strides = [1, 1]} : vector<2x96xf32> to vector<2x32xf32>
    %51 = vector.extract_strided_slice %47 {offsets = [0, 32], sizes = [2, 32], strides = [1, 1]} : vector<2x96xf32> to vector<2x32xf32>
    %52 = vector.extract_strided_slice %47 {offsets = [0, 64], sizes = [2, 32], strides = [1, 1]} : vector<2x96xf32> to vector<2x32xf32>
    %53 = arith.mulf %51, %29 : vector<2x32xf32>
    %54 = arith.mulf %50, %49 : vector<2x32xf32>
    %55 = arith.addf %53, %54 : vector<2x32xf32>
    %56 = math.tanh %55 : vector<2x32xf32>
    %57 = arith.mulf %52, %56 : vector<2x32xf32>
    %58 = vector.broadcast %7 : vector<1x32xf32> to vector<2x32xf32>
    %59 = arith.mulf %57, %58 : vector<2x32xf32>
    %cst_20 = arith.constant dense<0.000000e+00> : vector<2xf32>
    %60 = vector.multi_reduction <add>, %59, %cst_20 [1] : vector<2x32xf32> to vector<2xf32>
    %61 = vector.shape_cast %60 : vector<2xf32> to vector<2x1xf32>
    %62 = vector.extract_strided_slice %5 {offsets = [4, 0], sizes = [2, 128], strides = [1, 1]} : vector<16x128xf32> to vector<2x128xf32>
    %63 = arith.truncf %57 : vector<2x32xf32> to vector<2x32xbf16>
    %cst_21 = arith.constant dense<0.000000e+00> : vector<2x128xf32>
    %64 = tpu.matmul %63, %6, %cst_21 {dimension_numbers = #tpu.dot_dimension_numbers<[1], [0], [0], [1], [0, 0, 1, 1], [], []>} : vector<2x32xbf16>, vector<32x128xbf16>, vector<2x128xf32> -> vector<2x128xf32>
    %65 = arith.addf %62, %64 : vector<2x128xf32>
    %66 = vector.extract_strided_slice %65 {offsets = [0, 0], sizes = [2, 96], strides = [1, 1]} : vector<2x128xf32> to vector<2x96xf32>
    %cst_22 = arith.constant 5.000000e-01 : f32
    %67 = vector.broadcast %cst_22 : f32 to vector<2x96xf32>
    %68 = arith.mulf %67, %66 : vector<2x96xf32>
    %69 = math.tanh %68 : vector<2x96xf32>
    %cst_23 = arith.constant 1.000000e+00 : f32
    %70 = vector.broadcast %cst_23 : f32 to vector<2x96xf32>
    %71 = arith.addf %69, %70 : vector<2x96xf32>
    %cst_24 = arith.constant 5.000000e-01 : f32
    %72 = vector.broadcast %cst_24 : f32 to vector<2x96xf32>
    %73 = arith.mulf %72, %71 : vector<2x96xf32>
    %74 = vector.extract_strided_slice %65 {offsets = [0, 96], sizes = [2, 32], strides = [1, 1]} : vector<2x128xf32> to vector<2x32xf32>
    %75 = math.tanh %74 : vector<2x32xf32>
    %76 = vector.extract_strided_slice %73 {offsets = [0, 0], sizes = [2, 32], strides = [1, 1]} : vector<2x96xf32> to vector<2x32xf32>
    %77 = vector.extract_strided_slice %73 {offsets = [0, 32], sizes = [2, 32], strides = [1, 1]} : vector<2x96xf32> to vector<2x32xf32>
    %78 = vector.extract_strided_slice %73 {offsets = [0, 64], sizes = [2, 32], strides = [1, 1]} : vector<2x96xf32> to vector<2x32xf32>
    %79 = arith.mulf %77, %55 : vector<2x32xf32>
    %80 = arith.mulf %76, %75 : vector<2x32xf32>
    %81 = arith.addf %79, %80 : vector<2x32xf32>
    %82 = math.tanh %81 : vector<2x32xf32>
    %83 = arith.mulf %78, %82 : vector<2x32xf32>
    %84 = vector.broadcast %7 : vector<1x32xf32> to vector<2x32xf32>
    %85 = arith.mulf %83, %84 : vector<2x32xf32>
    %cst_25 = arith.constant dense<0.000000e+00> : vector<2xf32>
    %86 = vector.multi_reduction <add>, %85, %cst_25 [1] : vector<2x32xf32> to vector<2xf32>
    %87 = vector.shape_cast %86 : vector<2xf32> to vector<2x1xf32>
    %88 = vector.extract_strided_slice %5 {offsets = [6, 0], sizes = [2, 128], strides = [1, 1]} : vector<16x128xf32> to vector<2x128xf32>
    %89 = arith.truncf %83 : vector<2x32xf32> to vector<2x32xbf16>
    %cst_26 = arith.constant dense<0.000000e+00> : vector<2x128xf32>
    %90 = tpu.matmul %89, %6, %cst_26 {dimension_numbers = #tpu.dot_dimension_numbers<[1], [0], [0], [1], [0, 0, 1, 1], [], []>} : vector<2x32xbf16>, vector<32x128xbf16>, vector<2x128xf32> -> vector<2x128xf32>
    %91 = arith.addf %88, %90 : vector<2x128xf32>
    %92 = vector.extract_strided_slice %91 {offsets = [0, 0], sizes = [2, 96], strides = [1, 1]} : vector<2x128xf32> to vector<2x96xf32>
    %cst_27 = arith.constant 5.000000e-01 : f32
    %93 = vector.broadcast %cst_27 : f32 to vector<2x96xf32>
    %94 = arith.mulf %93, %92 : vector<2x96xf32>
    %95 = math.tanh %94 : vector<2x96xf32>
    %cst_28 = arith.constant 1.000000e+00 : f32
    %96 = vector.broadcast %cst_28 : f32 to vector<2x96xf32>
    %97 = arith.addf %95, %96 : vector<2x96xf32>
    %cst_29 = arith.constant 5.000000e-01 : f32
    %98 = vector.broadcast %cst_29 : f32 to vector<2x96xf32>
    %99 = arith.mulf %98, %97 : vector<2x96xf32>
    %100 = vector.extract_strided_slice %91 {offsets = [0, 96], sizes = [2, 32], strides = [1, 1]} : vector<2x128xf32> to vector<2x32xf32>
    %101 = math.tanh %100 : vector<2x32xf32>
    %102 = vector.extract_strided_slice %99 {offsets = [0, 0], sizes = [2, 32], strides = [1, 1]} : vector<2x96xf32> to vector<2x32xf32>
    %103 = vector.extract_strided_slice %99 {offsets = [0, 32], sizes = [2, 32], strides = [1, 1]} : vector<2x96xf32> to vector<2x32xf32>
    %104 = vector.extract_strided_slice %99 {offsets = [0, 64], sizes = [2, 32], strides = [1, 1]} : vector<2x96xf32> to vector<2x32xf32>
    %105 = arith.mulf %103, %81 : vector<2x32xf32>
    %106 = arith.mulf %102, %101 : vector<2x32xf32>
    %107 = arith.addf %105, %106 : vector<2x32xf32>
    %108 = math.tanh %107 : vector<2x32xf32>
    %109 = arith.mulf %104, %108 : vector<2x32xf32>
    %110 = vector.broadcast %7 : vector<1x32xf32> to vector<2x32xf32>
    %111 = arith.mulf %109, %110 : vector<2x32xf32>
    %cst_30 = arith.constant dense<0.000000e+00> : vector<2xf32>
    %112 = vector.multi_reduction <add>, %111, %cst_30 [1] : vector<2x32xf32> to vector<2xf32>
    %113 = vector.shape_cast %112 : vector<2xf32> to vector<2x1xf32>
    %114 = vector.extract_strided_slice %5 {offsets = [8, 0], sizes = [2, 128], strides = [1, 1]} : vector<16x128xf32> to vector<2x128xf32>
    %115 = arith.truncf %109 : vector<2x32xf32> to vector<2x32xbf16>
    %cst_31 = arith.constant dense<0.000000e+00> : vector<2x128xf32>
    %116 = tpu.matmul %115, %6, %cst_31 {dimension_numbers = #tpu.dot_dimension_numbers<[1], [0], [0], [1], [0, 0, 1, 1], [], []>} : vector<2x32xbf16>, vector<32x128xbf16>, vector<2x128xf32> -> vector<2x128xf32>
    %117 = arith.addf %114, %116 : vector<2x128xf32>
    %118 = vector.extract_strided_slice %117 {offsets = [0, 0], sizes = [2, 96], strides = [1, 1]} : vector<2x128xf32> to vector<2x96xf32>
    %cst_32 = arith.constant 5.000000e-01 : f32
    %119 = vector.broadcast %cst_32 : f32 to vector<2x96xf32>
    %120 = arith.mulf %119, %118 : vector<2x96xf32>
    %121 = math.tanh %120 : vector<2x96xf32>
    %cst_33 = arith.constant 1.000000e+00 : f32
    %122 = vector.broadcast %cst_33 : f32 to vector<2x96xf32>
    %123 = arith.addf %121, %122 : vector<2x96xf32>
    %cst_34 = arith.constant 5.000000e-01 : f32
    %124 = vector.broadcast %cst_34 : f32 to vector<2x96xf32>
    %125 = arith.mulf %124, %123 : vector<2x96xf32>
    %126 = vector.extract_strided_slice %117 {offsets = [0, 96], sizes = [2, 32], strides = [1, 1]} : vector<2x128xf32> to vector<2x32xf32>
    %127 = math.tanh %126 : vector<2x32xf32>
    %128 = vector.extract_strided_slice %125 {offsets = [0, 0], sizes = [2, 32], strides = [1, 1]} : vector<2x96xf32> to vector<2x32xf32>
    %129 = vector.extract_strided_slice %125 {offsets = [0, 32], sizes = [2, 32], strides = [1, 1]} : vector<2x96xf32> to vector<2x32xf32>
    %130 = vector.extract_strided_slice %125 {offsets = [0, 64], sizes = [2, 32], strides = [1, 1]} : vector<2x96xf32> to vector<2x32xf32>
    %131 = arith.mulf %129, %107 : vector<2x32xf32>
    %132 = arith.mulf %128, %127 : vector<2x32xf32>
    %133 = arith.addf %131, %132 : vector<2x32xf32>
    %134 = math.tanh %133 : vector<2x32xf32>
    %135 = arith.mulf %130, %134 : vector<2x32xf32>
    %136 = vector.broadcast %7 : vector<1x32xf32> to vector<2x32xf32>
    %137 = arith.mulf %135, %136 : vector<2x32xf32>
    %cst_35 = arith.constant dense<0.000000e+00> : vector<2xf32>
    %138 = vector.multi_reduction <add>, %137, %cst_35 [1] : vector<2x32xf32> to vector<2xf32>
    %139 = vector.shape_cast %138 : vector<2xf32> to vector<2x1xf32>
    %140 = vector.extract_strided_slice %5 {offsets = [10, 0], sizes = [2, 128], strides = [1, 1]} : vector<16x128xf32> to vector<2x128xf32>
    %141 = arith.truncf %135 : vector<2x32xf32> to vector<2x32xbf16>
    %cst_36 = arith.constant dense<0.000000e+00> : vector<2x128xf32>
    %142 = tpu.matmul %141, %6, %cst_36 {dimension_numbers = #tpu.dot_dimension_numbers<[1], [0], [0], [1], [0, 0, 1, 1], [], []>} : vector<2x32xbf16>, vector<32x128xbf16>, vector<2x128xf32> -> vector<2x128xf32>
    %143 = arith.addf %140, %142 : vector<2x128xf32>
    %144 = vector.extract_strided_slice %143 {offsets = [0, 0], sizes = [2, 96], strides = [1, 1]} : vector<2x128xf32> to vector<2x96xf32>
    %cst_37 = arith.constant 5.000000e-01 : f32
    %145 = vector.broadcast %cst_37 : f32 to vector<2x96xf32>
    %146 = arith.mulf %145, %144 : vector<2x96xf32>
    %147 = math.tanh %146 : vector<2x96xf32>
    %cst_38 = arith.constant 1.000000e+00 : f32
    %148 = vector.broadcast %cst_38 : f32 to vector<2x96xf32>
    %149 = arith.addf %147, %148 : vector<2x96xf32>
    %cst_39 = arith.constant 5.000000e-01 : f32
    %150 = vector.broadcast %cst_39 : f32 to vector<2x96xf32>
    %151 = arith.mulf %150, %149 : vector<2x96xf32>
    %152 = vector.extract_strided_slice %143 {offsets = [0, 96], sizes = [2, 32], strides = [1, 1]} : vector<2x128xf32> to vector<2x32xf32>
    %153 = math.tanh %152 : vector<2x32xf32>
    %154 = vector.extract_strided_slice %151 {offsets = [0, 0], sizes = [2, 32], strides = [1, 1]} : vector<2x96xf32> to vector<2x32xf32>
    %155 = vector.extract_strided_slice %151 {offsets = [0, 32], sizes = [2, 32], strides = [1, 1]} : vector<2x96xf32> to vector<2x32xf32>
    %156 = vector.extract_strided_slice %151 {offsets = [0, 64], sizes = [2, 32], strides = [1, 1]} : vector<2x96xf32> to vector<2x32xf32>
    %157 = arith.mulf %155, %133 : vector<2x32xf32>
    %158 = arith.mulf %154, %153 : vector<2x32xf32>
    %159 = arith.addf %157, %158 : vector<2x32xf32>
    %160 = math.tanh %159 : vector<2x32xf32>
    %161 = arith.mulf %156, %160 : vector<2x32xf32>
    %162 = vector.broadcast %7 : vector<1x32xf32> to vector<2x32xf32>
    %163 = arith.mulf %161, %162 : vector<2x32xf32>
    %cst_40 = arith.constant dense<0.000000e+00> : vector<2xf32>
    %164 = vector.multi_reduction <add>, %163, %cst_40 [1] : vector<2x32xf32> to vector<2xf32>
    %165 = vector.shape_cast %164 : vector<2xf32> to vector<2x1xf32>
    %166 = vector.extract_strided_slice %5 {offsets = [12, 0], sizes = [2, 128], strides = [1, 1]} : vector<16x128xf32> to vector<2x128xf32>
    %167 = arith.truncf %161 : vector<2x32xf32> to vector<2x32xbf16>
    %cst_41 = arith.constant dense<0.000000e+00> : vector<2x128xf32>
    %168 = tpu.matmul %167, %6, %cst_41 {dimension_numbers = #tpu.dot_dimension_numbers<[1], [0], [0], [1], [0, 0, 1, 1], [], []>} : vector<2x32xbf16>, vector<32x128xbf16>, vector<2x128xf32> -> vector<2x128xf32>
    %169 = arith.addf %166, %168 : vector<2x128xf32>
    %170 = vector.extract_strided_slice %169 {offsets = [0, 0], sizes = [2, 96], strides = [1, 1]} : vector<2x128xf32> to vector<2x96xf32>
    %cst_42 = arith.constant 5.000000e-01 : f32
    %171 = vector.broadcast %cst_42 : f32 to vector<2x96xf32>
    %172 = arith.mulf %171, %170 : vector<2x96xf32>
    %173 = math.tanh %172 : vector<2x96xf32>
    %cst_43 = arith.constant 1.000000e+00 : f32
    %174 = vector.broadcast %cst_43 : f32 to vector<2x96xf32>
    %175 = arith.addf %173, %174 : vector<2x96xf32>
    %cst_44 = arith.constant 5.000000e-01 : f32
    %176 = vector.broadcast %cst_44 : f32 to vector<2x96xf32>
    %177 = arith.mulf %176, %175 : vector<2x96xf32>
    %178 = vector.extract_strided_slice %169 {offsets = [0, 96], sizes = [2, 32], strides = [1, 1]} : vector<2x128xf32> to vector<2x32xf32>
    %179 = math.tanh %178 : vector<2x32xf32>
    %180 = vector.extract_strided_slice %177 {offsets = [0, 0], sizes = [2, 32], strides = [1, 1]} : vector<2x96xf32> to vector<2x32xf32>
    %181 = vector.extract_strided_slice %177 {offsets = [0, 32], sizes = [2, 32], strides = [1, 1]} : vector<2x96xf32> to vector<2x32xf32>
    %182 = vector.extract_strided_slice %177 {offsets = [0, 64], sizes = [2, 32], strides = [1, 1]} : vector<2x96xf32> to vector<2x32xf32>
    %183 = arith.mulf %181, %159 : vector<2x32xf32>
    %184 = arith.mulf %180, %179 : vector<2x32xf32>
    %185 = arith.addf %183, %184 : vector<2x32xf32>
    %186 = math.tanh %185 : vector<2x32xf32>
    %187 = arith.mulf %182, %186 : vector<2x32xf32>
    %188 = vector.broadcast %7 : vector<1x32xf32> to vector<2x32xf32>
    %189 = arith.mulf %187, %188 : vector<2x32xf32>
    %cst_45 = arith.constant dense<0.000000e+00> : vector<2xf32>
    %190 = vector.multi_reduction <add>, %189, %cst_45 [1] : vector<2x32xf32> to vector<2xf32>
    %191 = vector.shape_cast %190 : vector<2xf32> to vector<2x1xf32>
    %192 = vector.extract_strided_slice %5 {offsets = [14, 0], sizes = [2, 128], strides = [1, 1]} : vector<16x128xf32> to vector<2x128xf32>
    %193 = arith.truncf %187 : vector<2x32xf32> to vector<2x32xbf16>
    %cst_46 = arith.constant dense<0.000000e+00> : vector<2x128xf32>
    %194 = tpu.matmul %193, %6, %cst_46 {dimension_numbers = #tpu.dot_dimension_numbers<[1], [0], [0], [1], [0, 0, 1, 1], [], []>} : vector<2x32xbf16>, vector<32x128xbf16>, vector<2x128xf32> -> vector<2x128xf32>
    %195 = arith.addf %192, %194 : vector<2x128xf32>
    %196 = vector.extract_strided_slice %195 {offsets = [0, 0], sizes = [2, 96], strides = [1, 1]} : vector<2x128xf32> to vector<2x96xf32>
    %cst_47 = arith.constant 5.000000e-01 : f32
    %197 = vector.broadcast %cst_47 : f32 to vector<2x96xf32>
    %198 = arith.mulf %197, %196 : vector<2x96xf32>
    %199 = math.tanh %198 : vector<2x96xf32>
    %cst_48 = arith.constant 1.000000e+00 : f32
    %200 = vector.broadcast %cst_48 : f32 to vector<2x96xf32>
    %201 = arith.addf %199, %200 : vector<2x96xf32>
    %cst_49 = arith.constant 5.000000e-01 : f32
    %202 = vector.broadcast %cst_49 : f32 to vector<2x96xf32>
    %203 = arith.mulf %202, %201 : vector<2x96xf32>
    %204 = vector.extract_strided_slice %195 {offsets = [0, 96], sizes = [2, 32], strides = [1, 1]} : vector<2x128xf32> to vector<2x32xf32>
    %205 = math.tanh %204 : vector<2x32xf32>
    %206 = vector.extract_strided_slice %203 {offsets = [0, 0], sizes = [2, 32], strides = [1, 1]} : vector<2x96xf32> to vector<2x32xf32>
    %207 = vector.extract_strided_slice %203 {offsets = [0, 32], sizes = [2, 32], strides = [1, 1]} : vector<2x96xf32> to vector<2x32xf32>
    %208 = vector.extract_strided_slice %203 {offsets = [0, 64], sizes = [2, 32], strides = [1, 1]} : vector<2x96xf32> to vector<2x32xf32>
    %209 = arith.mulf %207, %185 : vector<2x32xf32>
    %210 = arith.mulf %206, %205 : vector<2x32xf32>
    %211 = arith.addf %209, %210 : vector<2x32xf32>
    %212 = math.tanh %211 : vector<2x32xf32>
    %213 = arith.mulf %208, %212 : vector<2x32xf32>
    %214 = vector.broadcast %7 : vector<1x32xf32> to vector<2x32xf32>
    %215 = arith.mulf %213, %214 : vector<2x32xf32>
    %cst_50 = arith.constant dense<0.000000e+00> : vector<2xf32>
    %216 = vector.multi_reduction <add>, %215, %cst_50 [1] : vector<2x32xf32> to vector<2xf32>
    %217 = vector.shape_cast %216 : vector<2xf32> to vector<2x1xf32>
    %218 = tpu.concatenate %35, %61, %87, %113, %139, %165, %191, %217 in 1 : vector<2x1xf32>, vector<2x1xf32>, vector<2x1xf32>, vector<2x1xf32>, vector<2x1xf32>, vector<2x1xf32>, vector<2x1xf32>, vector<2x1xf32> -> vector<2x8xf32>
    %cst_51 = arith.constant dense<0xFF800000> : vector<2xf32>
    %219 = vector.multi_reduction <maximumf>, %218, %cst_51 [1] : vector<2x8xf32> to vector<2xf32>
    %220 = vector.shape_cast %219 : vector<2xf32> to vector<2x1xf32>
    %221 = vector.broadcast %220 : vector<2x1xf32> to vector<2x8xf32>
    %222 = arith.subf %218, %221 : vector<2x8xf32>
    %223 = math.exp %222 : vector<2x8xf32>
    %cst_52 = arith.constant dense<0.000000e+00> : vector<2xf32>
    %224 = vector.multi_reduction <add>, %223, %cst_52 [1] : vector<2x8xf32> to vector<2xf32>
    %225 = vector.shape_cast %224 : vector<2xf32> to vector<2x1xf32>
    %226 = vector.broadcast %225 : vector<2x1xf32> to vector<2x8xf32>
    %227 = arith.divf %223, %226 : vector<2x8xf32>
    %c0_53 = arith.constant 0 : index
    %c0_54 = arith.constant 0 : index
    %228 = vector.load %arg6[%c0_53, %c0_54] : memref<2x8xf32, #tpu.memory_space<vmem>>, vector<2x8xf32>
    tpu.vector_store %arg6[%c0_53, %c0_54], %227 {strides = array<i32>} : memref<2x8xf32, #tpu.memory_space<vmem>>, vector<2x8xf32>,
    %229 = vector.extract_strided_slice %227 {offsets = [0, 0], sizes = [2, 1], strides = [1, 1]} : vector<2x8xf32> to vector<2x1xf32>
    %230 = vector.broadcast %229 : vector<2x1xf32> to vector<2x32xf32>
    %231 = arith.mulf %230, %31 : vector<2x32xf32>
    %232 = vector.extract_strided_slice %227 {offsets = [0, 1], sizes = [2, 1], strides = [1, 1]} : vector<2x8xf32> to vector<2x1xf32>
    %233 = vector.broadcast %232 : vector<2x1xf32> to vector<2x32xf32>
    %234 = arith.mulf %233, %57 : vector<2x32xf32>
    %235 = arith.addf %231, %234 : vector<2x32xf32>
    %236 = vector.extract_strided_slice %227 {offsets = [0, 2], sizes = [2, 1], strides = [1, 1]} : vector<2x8xf32> to vector<2x1xf32>
    %237 = vector.broadcast %236 : vector<2x1xf32> to vector<2x32xf32>
    %238 = arith.mulf %237, %83 : vector<2x32xf32>
    %239 = arith.addf %235, %238 : vector<2x32xf32>
    %240 = vector.extract_strided_slice %227 {offsets = [0, 3], sizes = [2, 1], strides = [1, 1]} : vector<2x8xf32> to vector<2x1xf32>
    %241 = vector.broadcast %240 : vector<2x1xf32> to vector<2x32xf32>
    %242 = arith.mulf %241, %109 : vector<2x32xf32>
    %243 = arith.addf %239, %242 : vector<2x32xf32>
    %244 = vector.extract_strided_slice %227 {offsets = [0, 4], sizes = [2, 1], strides = [1, 1]} : vector<2x8xf32> to vector<2x1xf32>
    %245 = vector.broadcast %244 : vector<2x1xf32> to vector<2x32xf32>
    %246 = arith.mulf %245, %135 : vector<2x32xf32>
    %247 = arith.addf %243, %246 : vector<2x32xf32>
    %248 = vector.extract_strided_slice %227 {offsets = [0, 5], sizes = [2, 1], strides = [1, 1]} : vector<2x8xf32> to vector<2x1xf32>
    %249 = vector.broadcast %248 : vector<2x1xf32> to vector<2x32xf32>
    %250 = arith.mulf %249, %161 : vector<2x32xf32>
    %251 = arith.addf %247, %250 : vector<2x32xf32>
    %252 = vector.extract_strided_slice %227 {offsets = [0, 6], sizes = [2, 1], strides = [1, 1]} : vector<2x8xf32> to vector<2x1xf32>
    %253 = vector.broadcast %252 : vector<2x1xf32> to vector<2x32xf32>
    %254 = arith.mulf %253, %187 : vector<2x32xf32>
    %255 = arith.addf %251, %254 : vector<2x32xf32>
    %256 = vector.extract_strided_slice %227 {offsets = [0, 7], sizes = [2, 1], strides = [1, 1]} : vector<2x8xf32> to vector<2x1xf32>
    %257 = vector.broadcast %256 : vector<2x1xf32> to vector<2x32xf32>
    %258 = arith.mulf %257, %213 : vector<2x32xf32>
    %259 = arith.addf %255, %258 : vector<2x32xf32>
    %c0_55 = arith.constant 0 : index
    %c0_56 = arith.constant 0 : index
    %260 = vector.load %arg5[%c0_55, %c0_56] : memref<2x32xf32, #tpu.memory_space<vmem>>, vector<2x32xf32>
    tpu.vector_store %arg5[%c0_55, %c0_56], %259 {strides = array<i32>} : memref<2x32xf32, #tpu.memory_space<vmem>>, vector<2x32xf32>,
    return
  }
}

</mosaic_0001>

<bundles_post_ra>
// kernel: recurrent_encoder_forward.1
= control target key start
LH: loop header
LB: loop body
LE: loop exit
PB: predicated region body
PF: predicated region fallthrough
CT: control target
= control target key end

     0   :  { %12 = vsyncpa [#allocation3], 0  ;;  %vm44_vm0 = vcmask 1041408   ;;  %v1192_v1 = vmov 0.0   ;;  %vm1193_vm1 = vmmov 0   ;;  %vm40_vm2 = vcmask 31744   ;;  %s1450_s0 = inlined_call_operand.vmem [shape: bf16[16,4], index: 0, kind: input, shape index: {}]   ;;  %s1451_s1 = inlined_call_operand.vmem [shape: bf16[4,128], index: 1, kind: input, shape index: {}]   ;;  %s1452_s2 = inlined_call_operand.vmem [shape: bf16[32,128], index: 2, kind: input, shape index: {}]   ;;  %s1453_s3 = inlined_call_operand.vmem [shape: f32[1,128], index: 3, kind: input, shape index: {}]   ;;  %s1454_s4 = inlined_call_operand.vmem [shape: f32[1,32], index: 4, kind: input, shape index: {}]   ;;  %s1455_s5 = inlined_call_operand.hbm [shape: f32[2,32], index: 5, kind: output, shape index: {0}]   ;;  %s1456_s6 = inlined_call_operand.hbm [shape: f32[2,8], index: 6, kind: output, shape index: {1}]  }
   0x1   :  { %v27_v0 = vld [vmem:[%s1451_s1] sm:$0x3]  ;;  %1001 = vmatprep.subr.bf16.mxu0 %v1192_v1  ;;  %1007 = vmatprep.subr.bf16.mxu1 %v1192_v1  ;;  %v1249_v3 = vld [vmem:[%s1452_s2 + $0x8] sm:$0xff]  }
   0x2   :  { %v46_v2 = vsel %vm44_vm0, %v27_v0, 0  ;;  %v1094_v4 = vld [vmem:[%s1450_s0] sm:$0xff]   ;;  %1003 = vmatprep.mubr.msk.bf16.mxu0 %vm1193_vm1, %v1192_v1  ;;  %1008 = vmatpush3.bf16.msra.mxu1 %v1249_v3 }
   0x3   :  { %1002 = vmatpush3.bf16.msra.mxu0 %v46_v2  ;;  %v1260_v5 = vld [vmem:[%s1452_s2] sm:$0xff]   ;;  %1011 = vmatprep.mubr.msk.bf16.mxu1 %vm1193_vm1, %v1192_v1 }
   0x4   :  { %1009 = vmatprep.subr.bf16.mxu1 %v1192_v1  ;;  %1015 = vmatprep.subr.bf16.mxu0 %v1192_v1 }
   0x5   :  { %13 = vsyncpa [#allocation5], 0  ;;  %v1194_v6 = vmov 0   ;;  %v962_v7 = vld [vmem:[%s1453_s3] ss:$0 sm:$0xff]  ;;  %s1195_s28 = smov 32  }
   0x6   :  { %1004 = vmatmul.mubr.msk.bf16.vlgmr.msra.gmra.mxu0 %vm40_vm2, %v1094_v4  ;;  %1085 = vset.pattern.permute.xlu1 %v1194_v6  ;;  %s1196_s3 = smov 64   ;;  %vm106_vm3 = vcmask 261120   ;;  %vm271_vm4 = vcmask 257026   ;;  %vm186_vm5 = vcmask 254976   ;;  %vm443_vm6 = vcmask 261126  }
   0x7   :  { %1016 = vmatpush3.bf16.msra.mxu0 %v1249_v3  ;;  %1019 = vmatprep.mubr.msk.bf16.mxu0 %vm1193_vm1, %v1192_v1  ;;  %vm357_vm7 = vcmask 259076   ;;  %vm801_vm8 = vcmask 7168   ;;  %vm803_vm9 = vcmask 15360   ;;  %vm805_vm10 = vcmask 23552  }
   0x8   :  { %1010 = vmatpush3.bf16.msra.mxu1 %v1260_v5  ;;  %1017 = vmatprep.subr.bf16.mxu0 %v1192_v1  ;;  %vm808_vm11 = vcmask 39936   ;;  %vm810_vm12 = vcmask 48128   ;;  %vm812_vm13 = vcmask 56320   ;;  %vm814_vm14 = vcmask 58368  }
   0x9   :  { %1023 = vmatprep.subr.bf16.mxu1 %v1192_v1 }
   0xb   :  { %1012 = vmatmul.mubr.bf16.vlgmr.msra.gmra.mxu1 %v1194_v6  ;;  %1018 = vmatpush3.bf16.msra.mxu0 %v1260_v5 }
   0xc   :  { %1024 = vmatpush3.bf16.msra.mxu1 %v1249_v3  ;;  %1027 = vmatprep.mubr.msk.bf16.mxu1 %vm1193_vm1, %v1192_v1 }
   0xd   :  { %1025 = vmatprep.subr.bf16.mxu1 %v1192_v1  ;;  %1031 = vmatprep.subr.bf16.mxu0 %v1192_v1 }
  0x10   :  { %1026 = vmatpush3.bf16.msra.mxu1 %v1260_v5 }
  0x11   :  { %1039 = vmatprep.subr.bf16.mxu1 %v1192_v1 }
  0xc6   :  { %v82_v8 = vpop.f32.mrf.mxu0 }
  0xc7   :  { %v1284_v9 = vadd.f32 %v962_v7, %v82_v8 }
  0xc8   :  { %v1005_v10 = vpop.f32.mrf.mxu0 }
  0xca   :  { %v85_v11 = vpop.f32.mrf.mxu0 }
  0xcb   :  { %v1286_v12 = vadd.f32 %v962_v7, %v85_v11  ;;  %v144_v13 = vpop.f32.mrf.mxu1 }
  0xcc   :  { %v150_v14 = vadd.f32 %v144_v13, %v1284_v9  ;;  %v1006_v15 = vpop.f32.mrf.mxu0 }
  0xcd   :  { %v1013_v16 = vpop.f32.mrf.mxu1 }
  0xce   :  { %1096 = vtanh.f32 %v150_v14  ;;  %v151_v20 = vmul.f32 0.5, %v150_v14 }
  0xcf   :  { %v147_v17 = vpop.f32.mrf.mxu1 }
  0xd0   :  { %1098 = vtanh.f32 %v151_v20 }
  0xd1   :  { %v1014_v18 = vpop.f32.mrf.mxu1 }
  0xdb   :  { %v1097_v19 = vpop.eup %1096 }
  0xdc   :  { %158 = vrot.lane.b32.xlu0 %v1097_v19, %s1195_s28 }
  0xdd   :  { %v1099_v21 = vpop.eup %1098 }
  0xde   :  { %v153_v22 = vadd.f32 1.0, %v1099_v21 }
  0xe0   :  { %v154_v23 = vmul.f32 0.5, %v153_v22 }
  0xe2   :  { %v156_v26 = vmul.f32 0.0, %v154_v23 }
 0x14e   :  { %v159_v24 = vpop.permute.xlu0 %158 }
 0x14f   :  { %v161_v25 = vmul.f32 %v159_v24, %v154_v23 }
 0x151   :  { %163 = vrot.lane.b32.xlu0 %v161_v25, %s1195_s28 }
 0x1c3   :  { %v164_v27 = vpop.permute.xlu0 %163 }
 0x1c4   :  { %v166_v28 = vadd.f32 %v164_v27, %v156_v26 }
 0x1c6   :  { %1100 = vtanh.f32 %v166_v28  ;;  %v247_v47 = vrot.slane %v166_v28, 6 }
 0x1d3   :  { %v1101_v29 = vpop.eup %1100 }
 0x1d4   :  { %169 = vrot.lane.b32.xlu1 %v1101_v29, %s1195_s28 }
 0x246   :  { %v170_v30 = vpop.permute.xlu1 %169 }
 0x247   :  { %v1292_v31 = vmul.f32 %v170_v30, %v154_v23 }
 0x249   :  { %v190_v32 = vpack.c.bf16 %v1292_v31, %v1292_v31 }
 0x24b   :  { %192 = vrot.lane.b32.xlu1 %v190_v32, %s1196_s3 }
 0x2bd   :  { %v193_v33 = vpop.permute.xlu1 %192 }
 0x2be   :  { %1020 = vmatmul.mubr.msk.bf16.vlgmr.msra.gmra.mxu0 %vm106_vm3, %v193_v33 }
 0x2bf   :  { %1032 = vmatpush3.bf16.msra.mxu0 %v1249_v3  ;;  %1035 = vmatprep.mubr.msk.bf16.mxu0 %vm1193_vm1, %v1192_v1 }
 0x2c0   :  { %1033 = vmatprep.subr.bf16.mxu0 %v1192_v1 }
 0x2c3   :  { %1034 = vmatpush3.bf16.msra.mxu0 %v1260_v5 }
 0x2c4   :  { %1047 = vmatprep.subr.bf16.mxu0 %v1192_v1 }
 0x37e   :  { %v231_v34 = vpop.f32.mrf.mxu0 }
 0x37f   :  { %v238_v35 = vrot.slane %v231_v34, 6 }
 0x380   :  { %v1021_v36 = vpop.f32.mrf.mxu0 }
 0x381   :  { %v240_v37 = vadd.f32 %v238_v35, %v1284_v9 }
 0x382   :  { %v234_v38 = vpop.f32.mrf.mxu0 }
 0x383   :  { %1102 = vtanh.f32 %v240_v37  ;;  %v241_v41 = vmul.f32 0.5, %v240_v37 }
 0x384   :  { %v1022_v39 = vpop.f32.mrf.mxu0 }
 0x385   :  { %1104 = vtanh.f32 %v241_v41 }
 0x390   :  { %v1103_v40 = vpop.eup %1102 }
 0x391   :  { %251 = vrot.lane.b32.xlu0 %v1103_v40, %s1195_s28 }
 0x392   :  { %v1105_v42 = vpop.eup %1104 }
 0x393   :  { %v243_v43 = vadd.f32 1.0, %v1105_v42 }
 0x395   :  { %v244_v44 = vmul.f32 0.5, %v243_v43 }
 0x397   :  { %v249_v48 = vmul.f32 %v247_v47, %v244_v44 }
 0x403   :  { %v252_v45 = vpop.permute.xlu0 %251 }
 0x404   :  { %v254_v46 = vmul.f32 %v252_v45, %v244_v44 }
 0x406   :  { %256 = vrot.lane.b32.xlu1 %v254_v46, %s1195_s28 }
 0x478   :  { %v257_v49 = vpop.permute.xlu1 %256 }
 0x479   :  { %v259_v50 = vadd.f32 %v257_v49, %v249_v48 }
 0x47b   :  { %1106 = vtanh.f32 %v259_v50  ;;  %v333_v10 = vrot.slane %v259_v50, 6 }
 0x488   :  { %v1107_v51 = vpop.eup %1106 }
 0x489   :  { %262 = vrot.lane.b32.xlu0 %v1107_v51, %s1195_s28 }
 0x4fb   :  { %v263_v52 = vpop.permute.xlu0 %262 }
 0x4fc   :  { %v1308_v53 = vmul.f32 %v263_v52, %v244_v44 }
 0x4fe   :  { %v275_v54 = vpack.c.bf16 %v1308_v53, %v1308_v53 }
 0x500   :  { %v277_v55 = vrot.slane %v275_v54, 1 }
 0x502   :  { %278 = vrot.lane.b32.xlu1 %v277_v55, %s1196_s3 }
 0x574   :  { %v279_v56 = vpop.permute.xlu1 %278 }
 0x575   :  { %1028 = vmatmul.mubr.msk.bf16.vlgmr.msra.gmra.mxu1 %vm106_vm3, %v279_v56 }
 0x576   :  { %1040 = vmatpush3.bf16.msra.mxu1 %v1249_v3  ;;  %1043 = vmatprep.mubr.msk.bf16.mxu1 %vm1193_vm1, %v1192_v1 }
 0x577   :  { %1041 = vmatprep.subr.bf16.mxu1 %v1192_v1 }
 0x57a   :  { %1042 = vmatpush3.bf16.msra.mxu1 %v1260_v5 }
 0x57b   :  { %1055 = vmatprep.subr.bf16.mxu1 %v1192_v1 }
 0x635   :  { %v317_v57 = vpop.f32.mrf.mxu1 }
 0x636   :  { %v324_v58 = vrot.slane %v317_v57, 4 }
 0x637   :  { %v1029_v59 = vpop.f32.mrf.mxu1 }
 0x638   :  { %v326_v60 = vadd.f32 %v324_v58, %v1284_v9 }
 0x639   :  { %v320_v61 = vpop.f32.mrf.mxu1 }
 0x63a   :  { %1108 = vtanh.f32 %v326_v60  ;;  %v327_v0 = vmul.f32 0.5, %v326_v60 }
 0x63b   :  { %v1030_v62 = vpop.f32.mrf.mxu1 }
 0x63c   :  { %1110 = vtanh.f32 %v327_v0 }
 0x647   :  { %v1109_v63 = vpop.eup %1108 }
 0x648   :  { %337 = vrot.lane.b32.xlu0 %v1109_v63, %s1195_s28 }
 0x649   :  { %v1111_v2 = vpop.eup %1110 }
 0x64a   :  { %v329_v4 = vadd.f32 1.0, %v1111_v2 }
 0x64c   :  { %v330_v6 = vmul.f32 0.5, %v329_v4 }
 0x64e   :  { %v335_v11 = vmul.f32 %v333_v10, %v330_v6 }
 0x6ba   :  { %v338_v7 = vpop.permute.xlu0 %337 }
 0x6bb   :  { %v340_v8 = vmul.f32 %v338_v7, %v330_v6 }
 0x6bd   :  { %342 = vrot.lane.b32.xlu1 %v340_v8, %s1195_s28 }
 0x72f   :  { %v343_v13 = vpop.permute.xlu1 %342 }
 0x730   :  { %v345_v14 = vadd.f32 %v343_v13, %v335_v11 }
 0x732   :  { %1112 = vtanh.f32 %v345_v14  ;;  %v419_v35 = vrot.slane %v345_v14, 6 }
 0x73f   :  { %v1113_v15 = vpop.eup %1112 }
 0x740   :  { %348 = vrot.lane.b32.xlu0 %v1113_v15, %s1195_s28 }
 0x7b2   :  { %v349_v16 = vpop.permute.xlu0 %348 }
 0x7b3   :  { %v1324_v17 = vmul.f32 %v349_v16, %v330_v6 }
 0x7b5   :  { %v361_v18 = vpack.c.bf16 %v1324_v17, %v1324_v17 }
 0x7b7   :  { %v363_v19 = vrot.slane %v361_v18, 2 }
 0x7b9   :  { %364 = vrot.lane.b32.xlu1 %v363_v19, %s1196_s3 }
 0x82b   :  { %v365_v20 = vpop.permute.xlu1 %364 }
 0x82c   :  { %1036 = vmatmul.mubr.msk.bf16.vlgmr.msra.gmra.mxu0 %vm106_vm3, %v365_v20 }
 0x82d   :  { %1048 = vmatpush3.bf16.msra.mxu0 %v1249_v3  ;;  %1051 = vmatprep.mubr.msk.bf16.mxu0 %vm1193_vm1, %v1192_v1 }
 0x82e   :  { %1049 = vmatprep.subr.bf16.mxu0 %v1192_v1 }
 0x831   :  { %1050 = vmatpush3.bf16.msra.mxu0 %v1260_v5 }
 0x832   :  { %1063 = vmatprep.subr.bf16.mxu0 %v1192_v1 }
 0x8ec   :  { %v403_v21 = vpop.f32.mrf.mxu0 }
 0x8ed   :  { %v410_v22 = vrot.slane %v403_v21, 2 }
 0x8ee   :  { %v1037_v23 = vpop.f32.mrf.mxu0 }
 0x8ef   :  { %v412_v24 = vadd.f32 %v410_v22, %v1284_v9 }
 0x8f0   :  { %v406_v25 = vpop.f32.mrf.mxu0 }
 0x8f1   :  { %1114 = vtanh.f32 %v412_v24  ;;  %v413_v28 = vmul.f32 0.5, %v412_v24 }
 0x8f2   :  { %v1038_v26 = vpop.f32.mrf.mxu0 }
 0x8f3   :  { %1116 = vtanh.f32 %v413_v28 }
 0x8fe   :  { %v1115_v27 = vpop.eup %1114 }
 0x8ff   :  { %423 = vrot.lane.b32.xlu0 %v1115_v27, %s1195_s28 }
 0x900   :  { %v1117_v29 = vpop.eup %1116 }
 0x901   :  { %v415_v30 = vadd.f32 1.0, %v1117_v29 }
 0x903   :  { %v416_v32 = vmul.f32 0.5, %v415_v30 }
 0x905   :  { %v421_v36 = vmul.f32 %v419_v35, %v416_v32 }
 0x971   :  { %v424_v33 = vpop.permute.xlu0 %423 }
 0x972   :  { %v426_v34 = vmul.f32 %v424_v33, %v416_v32 }
 0x974   :  { %428 = vrot.lane.b32.xlu1 %v426_v34, %s1195_s28 }
 0x9e6   :  { %v429_v37 = vpop.permute.xlu1 %428 }
 0x9e7   :  { %v431_v38 = vadd.f32 %v429_v37, %v421_v36 }
 0x9e9   :  { %1118 = vtanh.f32 %v431_v38  ;;  %v502_v57 = vrot.slane %v431_v38, 6 }
 0x9f6   :  { %v1119_v9 = vpop.eup %1118 }
 0x9f7   :  { %434 = vrot.lane.b32.xlu0 %v1119_v9, %s1195_s28 }
 0xa69   :  { %v435_v39 = vpop.permute.xlu0 %434 }
 0xa6a   :  { %v1340_v40 = vmul.f32 %v435_v39, %v416_v32 }
 0xa6c   :  { %v447_v41 = vpack.c.bf16 %v1340_v40, %v1340_v40 }
 0xa6e   :  { %v449_v42 = vrot.slane %v447_v41, 3 }
 0xa70   :  { %450 = vrot.lane.b32.xlu1 %v449_v42, %s1196_s3 }
 0xae2   :  { %v451_v43 = vpop.permute.xlu1 %450 }
 0xae3   :  { %1044 = vmatmul.mubr.msk.bf16.vlgmr.msra.gmra.mxu1 %vm106_vm3, %v451_v43 }
 0xae4   :  { %1056 = vmatpush3.bf16.msra.mxu1 %v1249_v3  ;;  %1059 = vmatprep.mubr.msk.bf16.mxu1 %vm1193_vm1, %v1192_v1 }
 0xae5   :  { %1057 = vmatprep.subr.bf16.mxu1 %v1192_v1 }
 0xae8   :  { %1058 = vmatpush3.bf16.msra.mxu1 %v1260_v5 }
 0xba3   :  { %v489_v44 = vpop.f32.mrf.mxu1 }
 0xba4   :  { %v495_v45 = vadd.f32 %v489_v44, %v1286_v12 }
 0xba5   :  { %v1045_v46 = vpop.f32.mrf.mxu1 }
 0xba6   :  { %1120 = vtanh.f32 %v495_v45  ;;  %v496_v50 = vmul.f32 0.5, %v495_v45 }
 0xba7   :  { %v492_v47 = vpop.f32.mrf.mxu1 }
 0xba8   :  { %1122 = vtanh.f32 %v496_v50 }
 0xba9   :  { %v1046_v48 = vpop.f32.mrf.mxu1 }
 0xbb3   :  { %v1121_v49 = vpop.eup %1120 }
 0xbb4   :  { %506 = vrot.lane.b32.xlu0 %v1121_v49, %s1195_s28 }
 0xbb5   :  { %v1123_v51 = vpop.eup %1122 }
 0xbb6   :  { %v498_v52 = vadd.f32 1.0, %v1123_v51 }
 0xbb8   :  { %v499_v54 = vmul.f32 0.5, %v498_v52 }
 0xbba   :  { %v504_v58 = vmul.f32 %v502_v57, %v499_v54 }
 0xc26   :  { %v507_v55 = vpop.permute.xlu0 %506 }
 0xc27   :  { %v509_v56 = vmul.f32 %v507_v55, %v499_v54 }
 0xc29   :  { %511 = vrot.lane.b32.xlu1 %v509_v56, %s1195_s28 }
 0xc9b   :  { %v512_v59 = vpop.permute.xlu1 %511 }
 0xc9c   :  { %v514_v60 = vadd.f32 %v512_v59, %v504_v58 }
 0xc9e   :  { %1124 = vtanh.f32 %v514_v60 }
 0xcab   :  { %v1125_v61 = vpop.eup %1124 }
 0xcac   :  { %517 = vrot.lane.b32.xlu0 %v1125_v61, %s1195_s28 }
 0xd1e   :  { %v518_v62 = vpop.permute.xlu0 %517 }
 0xd1f   :  { %v1355_v63 = vmul.f32 %v518_v62, %v499_v54 }
 0xd21   :  { %v529_v0 = vpack.c.bf16 %v1355_v63, %v1355_v63 }
 0xd23   :  { %531 = vrot.lane.b32.xlu1 %v529_v0, %s1196_s3 }
 0xd95   :  { %v532_v2 = vpop.permute.xlu1 %531 }
 0xd96   :  { %1052 = vmatmul.mubr.msk.bf16.vlgmr.msra.gmra.mxu0 %vm106_vm3, %v532_v2 }
 0xd97   :  { %1064 = vmatpush3.bf16.msra.mxu0 %v1249_v3  ;;  %1067 = vmatprep.mubr.msk.bf16.mxu0 %vm1193_vm1, %v1192_v1 }
 0xd98   :  { %1065 = vmatprep.subr.bf16.mxu0 %v1192_v1 }
 0xd9b   :  { %1066 = vmatpush3.bf16.msra.mxu0 %v1260_v5  ;;  %v586_v5 = vrot.slane %v514_v60, 6  ;;  %v967_v60 = vld [vmem:[%s1454_s4] ss:$0 sm:$0xff]  ;;  %s1204_s4 = smov [#allocation4]  }
 0xd9c   :  { %s950_s7 = sshll.u32 %s1204_s4, 4  ;;  %s951_s7 = int_to_ptr.vmem [resolvable:$true] %s950_s7 }
 0xd9d   :  { %s1148_s8 = scalar_lea.vmem %s951_s7, 32  ;;  %p1153_p1 = scmp.lt.s32.totalorder %s951_s7, %s951_s7 }
 0xd9e   :  { %p1149_p0 = scmp.ne.s32.totalorder %s951_s7, %s1148_s8  ;;  %p1154_p2 = scmp.lt.s32.totalorder %s1148_s8, %s1148_s8 }
 0xda0   :  { %p1155_p3 = por %p1154_p2, %p1153_p1 }
 0xda2   :  { %p1156_p4 = pnand %p1155_p3, %p1149_p0 }
 0xe56   :  { %v570_v4 = vpop.f32.mrf.mxu0 }
 0xe57   :  { %v577_v6 = vrot.slane %v570_v4, 6 }
 0xe58   :  { %v1053_v7 = vpop.f32.mrf.mxu0 }
 0xe59   :  { %v579_v8 = vadd.f32 %v577_v6, %v1286_v12 }
 0xe5a   :  { %v573_v10 = vpop.f32.mrf.mxu0 }
 0xe5b   :  { %1126 = vtanh.f32 %v579_v8  ;;  %v580_v14 = vmul.f32 0.5, %v579_v8 }
 0xe5c   :  { %v1054_v11 = vpop.f32.mrf.mxu0 }
 0xe5d   :  { %1128 = vtanh.f32 %v580_v14 }
 0xe68   :  { %v1127_v13 = vpop.eup %1126 }
 0xe69   :  { %590 = vrot.lane.b32.xlu0 %v1127_v13, %s1195_s28 }
 0xe6a   :  { %v1129_v3 = vpop.eup %1128 }
 0xe6b   :  { %v582_v15 = vadd.f32 1.0, %v1129_v3 }
 0xe6d   :  { %v583_v16 = vmul.f32 0.5, %v582_v15 }
 0xe6f   :  { %v588_v19 = vmul.f32 %v586_v5, %v583_v16 }
 0xedb   :  { %v591_v18 = vpop.permute.xlu0 %590 }
 0xedc   :  { %v593_v1 = vmul.f32 %v591_v18, %v583_v16 }
 0xede   :  { %595 = vrot.lane.b32.xlu1 %v593_v1, %s1195_s28 }
 0xf50   :  { %v596_v20 = vpop.permute.xlu1 %595 }
 0xf51   :  { %v598_v21 = vadd.f32 %v596_v20, %v588_v19 }
 0xf53   :  { %1130 = vtanh.f32 %v598_v21  ;;  %v671_v42 = vrot.slane %v598_v21, 6 }
 0xf60   :  { %v1131_v22 = vpop.eup %1130 }
 0xf61   :  { %601 = vrot.lane.b32.xlu0 %v1131_v22, %s1195_s28 }
 0xfd3   :  { %v602_v23 = vpop.permute.xlu0 %601 }
 0xfd4   :  { %v1370_v24 = vmul.f32 %v602_v23, %v583_v16 }
 0xfd6   :  { %v613_v25 = vpack.c.bf16 %v1370_v24, %v1370_v24 }
 0xfd8   :  { %v615_v26 = vrot.slane %v613_v25, 1 }
 0xfda   :  { %616 = vrot.lane.b32.xlu1 %v615_v26, %s1196_s3 }
0x104c   :  { %v617_v27 = vpop.permute.xlu1 %616 }
0x104d   :  { %1060 = vmatmul.mubr.msk.bf16.vlgmr.msra.gmra.mxu1 %vm106_vm3, %v617_v27 }
0x110d   :  { %v655_v28 = vpop.f32.mrf.mxu1 }
0x110e   :  { %v662_v29 = vrot.slane %v655_v28, 4 }
0x110f   :  { %v1061_v30 = vpop.f32.mrf.mxu1 }
0x1110   :  { %v664_v32 = vadd.f32 %v662_v29, %v1286_v12 }
0x1111   :  { %v658_v33 = vpop.f32.mrf.mxu1 }
0x1112   :  { %1132 = vtanh.f32 %v664_v32  ;;  %v665_v36 = vmul.f32 0.5, %v664_v32 }
0x1113   :  { %v1062_v34 = vpop.f32.mrf.mxu1 }
0x1114   :  { %1134 = vtanh.f32 %v665_v36 }
0x111f   :  { %v1133_v35 = vpop.eup %1132 }
0x1120   :  { %675 = vrot.lane.b32.xlu0 %v1133_v35, %s1195_s28 }
0x1121   :  { %v1135_v37 = vpop.eup %1134 }
0x1122   :  { %v667_v38 = vadd.f32 1.0, %v1135_v37 }
0x1124   :  { %v668_v9 = vmul.f32 0.5, %v667_v38 }
0x1126   :  { %v673_v43 = vmul.f32 %v671_v42, %v668_v9 }
0x1192   :  { %v676_v39 = vpop.permute.xlu0 %675 }
0x1193   :  { %v678_v41 = vmul.f32 %v676_v39, %v668_v9 }
0x1195   :  { %680 = vrot.lane.b32.xlu1 %v678_v41, %s1195_s28 }
0x1207   :  { %v681_v44 = vpop.permute.xlu1 %680 }
0x1208   :  { %v683_v45 = vadd.f32 %v681_v44, %v673_v43 }
0x120a   :  { %1136 = vtanh.f32 %v683_v45  ;;  %v756_v13 = vrot.slane %v683_v45, 6 }
0x1217   :  { %v1137_v46 = vpop.eup %1136 }
0x1218   :  { %686 = vrot.lane.b32.xlu0 %v1137_v46, %s1195_s28 }
0x128a   :  { %v687_v47 = vpop.permute.xlu0 %686 }
0x128b   :  { %v1380_v48 = vmul.f32 %v687_v47, %v668_v9 }
0x128d   :  { %v698_v49 = vpack.c.bf16 %v1380_v48, %v1380_v48 }
0x128f   :  { %v700_v50 = vrot.slane %v698_v49, 2 }
0x1291   :  { %701 = vrot.lane.b32.xlu1 %v700_v50, %s1196_s3 }
0x1303   :  { %v702_v51 = vpop.permute.xlu1 %701 }
0x1304   :  { %1068 = vmatmul.mubr.msk.bf16.vlgmr.msra.gmra.mxu0 %vm106_vm3, %v702_v51 }
0x13c4   :  { %v740_v52 = vpop.f32.mrf.mxu0 }
0x13c5   :  { %v747_v54 = vrot.slane %v740_v52, 2 }
0x13c6   :  { %v1069_v55 = vpop.f32.mrf.mxu0 }
0x13c7   :  { %v749_v56 = vadd.f32 %v747_v54, %v1286_v12 }
0x13c8   :  { %v743_v57 = vpop.f32.mrf.mxu0 }
0x13c9   :  { %1138 = vtanh.f32 %v749_v56  ;;  %v750_v61 = vmul.f32 0.5, %v749_v56 }
0x13ca   :  { %v1070_v58 = vpop.f32.mrf.mxu0 }
0x13cb   :  { %1140 = vtanh.f32 %v750_v61 }
0x13d6   :  { %v1139_v59 = vpop.eup %1138 }
0x13d7   :  { %760 = vrot.lane.b32.xlu0 %v1139_v59, %s1195_s28 }
0x13d8   :  { %v1141_v62 = vpop.eup %1140 }
0x13d9   :  { %v752_v0 = vadd.f32 1.0, %v1141_v62 }
0x13db   :  { %178 = vrot.lane.b32.xlu0 %v967_v60, %s1196_s3  ;;  %v753_v2 = vmul.f32 0.5, %v752_v0 }
0x13dd   :  { %v758_v14 = vmul.f32 %v756_v13, %v753_v2  ;;  %v1197_v13 = vmov 1  }
0x13de   :  { %1086 = vset.pattern.permute.xlu0 %v1197_v13 }
0x1449   :  { %v761_v4 = vpop.permute.xlu0 %760 }
0x144a   :  { %v763_v6 = vmul.f32 %v761_v4, %v753_v2  ;;  %v853_v4 = vrot.slane %v1324_v17, 4 }
0x144c   :  { %765 = vrot.lane.b32.xlu1 %v763_v6, %s1195_s28  ;;  %v868_v6 = vrot.slane %v1340_v40, 6 }
0x144d   :  { %v179_v12 = vpop.permute.xlu0 %178 }
0x144e   :  { %v266_v7 = vmul.f32 %v1308_v53, %v179_v12  ;;  %v181_v8 = vmul.f32 %v179_v12, %v1292_v31  ;;  %v605_v10 = vmul.f32 %v1370_v24, %v179_v12  ;;  %v690_v11 = vmul.f32 %v1380_v48, %v179_v12 }
0x144f   :  { %v352_v20 = vmul.f32 %v1324_v17, %v179_v12  ;;  %v438_v21 = vmul.f32 %v1340_v40, %v179_v12  ;;  %v521_v22 = vmul.f32 %v1355_v63, %v179_v12  ;;  %v1198_v40 = vmov 4  }
0x1450   :  { %268 = vrot.lane.b32.xlu0 %v266_v7, %s1196_s3 }
0x1454   :  { %183 = vrot.lane.b32.xlu0 %v181_v8, %s1196_s3 }
0x1458   :  { %607 = vrot.lane.b32.xlu0 %v605_v10, %s1196_s3 }
0x145c   :  { %692 = vrot.lane.b32.xlu0 %v690_v11, %s1196_s3 }
0x14be   :  { %v766_v3 = vpop.permute.xlu1 %765 }
0x14bf   :  { %v768_v15 = vadd.f32 %v766_v3, %v758_v14  ;;  %v1199_v3 = vmov 2  }
0x14c1   :  { %1142 = vtanh.f32 %v768_v15  ;;  %v1200_v15 = vmov 7  }
0x14c2   :  { %v269_v16 = vpop.permute.xlu0 %268 }
0x14c3   :  { %v272_v18 = vsel %vm271_vm4, %v269_v16, 0.0  ;;  %v1201_v16 = vmov 3  }
0x14c4   :  { %273 = vadd.xlane.f32.xlu0 %v272_v18 }
0x14c6   :  { %v184_v1 = vpop.permute.xlu0 %183 }
0x14c7   :  { %v187_v5 = vsel %vm186_vm5, %v184_v1, 0.0  ;;  %v1202_v1 = vmov 5  }
0x14c8   :  { %188 = vadd.xlane.f32.xlu0 %v187_v5  ;;  %v1203_v5 = vmov 6  }
0x14ca   :  { %v608_v33 = vpop.permute.xlu0 %607 }
0x14cb   :  { %v610_v35 = vsel %vm271_vm4, %v608_v33, 0.0 }
0x14ce   :  { %v1143_v19 = vpop.eup %1142  ;;  %v693_v36 = vpop.permute.xlu0 %692 }
0x14cf   :  { %771 = vrot.lane.b32.xlu1 %v1143_v19, %s1195_s28  ;;  %v695_v37 = vsel %vm357_vm7, %v693_v36, 0.0  ;;  %v889_v19 = vrot.slane %v1370_v24, 2 }
0x14d3   :  { %354 = vrot.lane.b32.xlu1 %v352_v20, %s1196_s3  ;;  %v904_v20 = vrot.slane %v1380_v48, 4 }
0x14d7   :  { %440 = vrot.lane.b32.xlu1 %v438_v21, %s1196_s3 }
0x14db   :  { %523 = vrot.lane.b32.xlu1 %v521_v22, %s1196_s3 }
0x1541   :  { %v772_v23 = vpop.permute.xlu1 %771 }
0x1542   :  { %v1410_v25 = vmul.f32 %v772_v23, %v753_v2  ;;  %v838_v2 = vrot.slane %v1308_v53, 2 }
0x1544   :  { %v775_v26 = vmul.f32 %v1410_v25, %v179_v12  ;;  %v919_v18 = vrot.slane %v1410_v25, 6 }
0x1545   :  { %v355_v27 = vpop.permute.xlu1 %354 }
0x1546   :  { %777 = vrot.lane.b32.xlu1 %v775_v26, %s1196_s3  ;;  %v358_v34 = vsel %vm357_vm7, %v355_v27, 0.0 }
0x1549   :  { %v441_v28 = vpop.permute.xlu1 %440 }
0x154a   :  { %v444_v29 = vsel %vm443_vm6, %v441_v28, 0.0 }
0x154b   :  { %445 = vadd.xlane.f32.xlu0 %v444_v29 }
0x154d   :  { %v524_v30 = vpop.permute.xlu1 %523  ;;  %v274_v39 = vpop.xlane.xlu0 %273 }
0x154e   :  { %v526_v32 = vsel %vm186_vm5, %v524_v30, 0.0  ;;  %v784_v44 = vrot.slane %v274_v39, 2 }
0x154f   :  { %527 = vadd.xlane.f32.xlu0 %v526_v32 }
0x1551   :  { %v189_v42 = vpop.xlane.xlu0 %188 }
0x1552   :  { %v802_v47 = vsel %vm801_vm8, %v189_v42, %v784_v44 }
0x156a   :  { %359 = vadd.xlane.f32.xlu1 %v358_v34 }
0x156e   :  { %611 = vadd.xlane.f32.xlu1 %v610_v35 }
0x1572   :  { %696 = vadd.xlane.f32.xlu1 %v695_v37 }
0x15b8   :  { %v778_v38 = vpop.permute.xlu1 %777 }
0x15b9   :  { %v780_v9 = vsel %vm443_vm6, %v778_v38, 0.0 }
0x15ba   :  { %781 = vadd.xlane.f32.xlu0 %v780_v9 }
0x15d4   :  { %v446_v46 = vpop.xlane.xlu0 %445 }
0x15d5   :  { %v790_v50 = vrot.slane %v446_v46, 6 }
0x15d8   :  { %v528_v54 = vpop.xlane.xlu0 %527 }
0x15f3   :  { %v360_v41 = vpop.xlane.xlu1 %359 }
0x15f4   :  { %v787_v43 = vrot.slane %v360_v41, 4 }
0x15f6   :  { %v804_v49 = vsel %vm803_vm9, %v802_v47, %v787_v43 }
0x15f7   :  { %v612_v45 = vpop.xlane.xlu1 %611  ;;  %v806_v51 = vsel %vm805_vm10, %v804_v49, %v790_v50 }
0x15f8   :  { %v793_v55 = vrot.slane %v612_v45, 2  ;;  %v807_v56 = vsel %vm40_vm2, %v806_v51, %v528_v54 }
0x15fa   :  { %v809_v59 = vsel %vm808_vm11, %v807_v56, %v793_v55 }
0x15fb   :  { %v697_v52 = vpop.xlane.xlu1 %696 }
0x15fc   :  { %v796_v57 = vrot.slane %v697_v52, 4 }
0x15fe   :  { %v811_v61 = vsel %vm810_vm12, %v809_v59, %v796_v57 }
0x1643   :  { %v782_v58 = vpop.xlane.xlu0 %781 }
0x1644   :  { %v799_v60 = vrot.slane %v782_v58, 6 }
0x1646   :  { %v813_v62 = vsel %vm812_vm13, %v811_v61, %v799_v60 }
0x1647   :  { %v815_v0 = vsel %vm814_vm14, %v813_v62, -inf }
0x1648   :  { %816 = vmax.xlane.f32.xlu1 %v815_v0 }
0x1659   :  { %839 = vrot.lane.b32.xlu1 %v838_v2, %s1196_s3 }
0x165d   :  { %854 = vrot.lane.b32.xlu1 %v853_v4, %s1196_s3 }
0x1661   :  { %869 = vrot.lane.b32.xlu1 %v868_v6, %s1196_s3 }
0x16d1   :  { %v817_v12 = vpop.xlane.xlu1 %816 }
0x16d2   :  { %v818_v7 = vsub.f32 %v813_v62, %v817_v12 }
0x16d4   :  { %v819_v8 = vmul.f32 1.442695, %v818_v7 }
0x16d5   :  { %v840_v21 = vpop.permute.xlu1 %839 }
0x16d6   :  { %1144 = vpow2.f32 %v819_v8 }
0x16d9   :  { %v855_v22 = vpop.permute.xlu1 %854 }
0x16dd   :  { %v870_v23 = vpop.permute.xlu1 %869 }
0x16e3   :  { %v1145_v10 = vpop.eup %1144 }
0x16e4   :  { %v821_v11 = vsel %vm814_vm14, %v1145_v10, 0.0 }
0x16e5   :  { %822 = vadd.xlane.f32.xlu0 %v821_v11 }
0x176e   :  { %v823_v53 = vpop.xlane.xlu0 %822 }
0x176f   :  { %1146 = vrcp.f32 %v823_v53 }
0x177c   :  { %v1147_v14 = vpop.eup %1146 }
0x177d   :  { %v825_v17 = vmul.f32 %v1147_v14, %v1145_v10 }
0x177f   :  { %826 = vst.msk [vmem:[#allocation4] sm:$0x3] %vm814_vm14, %v825_v17  ;;  %834 = vperm.xlu0 %1086, %v825_v17   ;;  %829 = vperm.xlu1 %1085, %v825_v17  }
0x1783   :  { %1089 = vset.pattern.permute.xlu0 %v1198_v40  ;;  %1087 = vset.pattern.permute.xlu1 %v1199_v3 }
0x1784   :  { %879 = vperm.xlu0 %1089, %v825_v17   ;;  %849 = vperm.xlu1 %1087, %v825_v17  }
0x1788   :  { %1092 = vset.pattern.permute.xlu0 %v1200_v15  ;;  %1088 = vset.pattern.permute.xlu1 %v1201_v16 }
0x1789   :  { %915 = vperm.xlu0 %1092, %v825_v17   ;;  %864 = vperm.xlu1 %1088, %v825_v17  }
0x178d   :  { %920 = vrot.lane.b32.xlu0 %v919_v18, %s1196_s3  ;;  %1090 = vset.pattern.permute.xlu1 %v1202_v1 }
0x178e   :  { %885 = vperm.xlu1 %1090, %v825_v17  }
0x1792   :  { %1091 = vset.pattern.permute.xlu1 %v1203_v5 }
0x1793   :  { %900 = vperm.xlu1 %1091, %v825_v17  }
0x1797   :  { %890 = vrot.lane.b32.xlu1 %v889_v19, %s1196_s3 }
0x179b   :  { %905 = vrot.lane.b32.xlu1 %v904_v20, %s1196_s3 }
0x17fa   :  { %v835_v25 = vpop.permute.xlu0 %834  ;;  %v830_v26 = vpop.permute.xlu1 %829 }
0x17fb   :  { %v842_v27 = vmul.f32 %v840_v21, %v835_v25  ;;  %v832_v42 = vmul.f32 %v830_v26, %v1292_v31 }
0x17fd   :  { %844 = vrot.lane.b32.xlu1 %v842_v27, %s1196_s3 }
0x17ff   :  { %v850_v28 = vpop.permute.xlu1 %849  ;;  %v880_v32 = vpop.permute.xlu0 %879 }
0x1800   :  { %v857_v29 = vmul.f32 %v855_v22, %v850_v28  ;;  %v882_v47 = vmul.f32 %v880_v32, %v1355_v63 }
0x1802   :  { %859 = vrot.lane.b32.xlu1 %v857_v29, %s1196_s3 }
0x1804   :  { %v865_v30 = vpop.permute.xlu1 %864  ;;  %v916_v33 = vpop.permute.xlu0 %915 }
0x1805   :  { %v872_v24 = vmul.f32 %v870_v23, %v865_v30 }
0x1807   :  { %874 = vrot.lane.b32.xlu1 %v872_v24, %s1196_s3 }
0x1808   :  { %v921_v37 = vpop.permute.xlu0 %920 }
0x1809   :  { %v886_v48 = vpop.permute.xlu1 %885  ;;  %v923_v9 = vmul.f32 %v921_v37, %v916_v33 }
0x180e   :  { %v901_v34 = vpop.permute.xlu1 %900 }
0x1812   :  { %v891_v35 = vpop.permute.xlu1 %890 }
0x1813   :  { %v893_v36 = vmul.f32 %v891_v35, %v886_v48 }
0x1815   :  { %895 = vrot.lane.b32.xlu1 %v893_v36, %s1196_s3 }
0x1816   :  { %v906_v38 = vpop.permute.xlu1 %905 }
0x1817   :  { %v908_v39 = vmul.f32 %v906_v38, %v901_v34 }
0x1819   :  { %925 = vrot.lane.b32.xlu1 %v923_v9, %s1196_s3  ;;  %910 = vrot.lane.b32.xlu0 %v908_v39, %s1196_s3 }
0x186f   :  { %v845_v41 = vpop.permute.xlu1 %844 }
0x1870   :  { %v847_v44 = vadd.f32 %v845_v41, %v832_v42 }
0x1874   :  { %v860_v43 = vpop.permute.xlu1 %859 }
0x1875   :  { %v862_v45 = vadd.f32 %v860_v43, %v847_v44 }
0x1879   :  { %v875_v46 = vpop.permute.xlu1 %874 }
0x187a   :  { %v877_v49 = vadd.f32 %v875_v46, %v862_v45 }
0x187c   :  { %v883_v50 = vadd.f32 %v882_v47, %v877_v49 }
0x187d   :  { %1159 = shalt.err (!%p1156_p4)
}
0x187e   :  { %953 = dma.vmem_to_hbm [thread:$0]  %s951_s7, 32, %s1456_s6, [#allocation5]  }
0x187f   :  { %s1205_s11 = smov [#allocation2]  }
0x1880   :  { %s940_s12 = sshll.u32 %s1205_s11, 4  ;;  %s941_s12 = int_to_ptr.vmem [resolvable:$true] %s940_s12 }
0x1881   :  { %s1168_s13 = scalar_lea.vmem %s941_s12, 32  ;;  %p1173_p6 = scmp.lt.s32.totalorder %s941_s12, %s941_s12 }
0x1882   :  { %p1169_p5 = scmp.ne.s32.totalorder %s941_s12, %s1168_s13  ;;  %p1174_p7 = scmp.lt.s32.totalorder %s1168_s13, %s1168_s13 }
0x1884   :  { %p1175_p8 = por %p1174_p7, %p1173_p6 }
0x1886   :  { %p1176_p9 = pnand %p1175_p8, %p1169_p5 }
0x1887   :  { %v896_v31 = vpop.permute.xlu1 %895 }
0x1888   :  { %v898_v51 = vadd.f32 %v896_v31, %v883_v50 }
0x188b   :  { %v911_v52 = vpop.permute.xlu0 %910  ;;  %v926_v54 = vpop.permute.xlu1 %925 }
0x188c   :  { %v913_v63 = vadd.f32 %v911_v52, %v898_v51 }
0x188e   :  { %v928_v55 = vadd.f32 %v926_v54, %v913_v63 }
0x1890   :  { %930 = vrot.lane.b32.xlu0 %v928_v55, %s1196_s3 }
0x1902   :  { %v931_v56 = vpop.permute.xlu0 %930 }
0x1903   :  { %933 = vst.msk [vmem:[#allocation2] sm:$0x3] %vm186_vm5, %v931_v56 }
0x1904   :  { %1179 = shalt.err (!%p1176_p9)
}
0x1905   :  { %943 = dma.vmem_to_hbm [thread:$0]  %s941_s12, 32, %s1455_s5, [#allocation3]  }
0x1906   :  { %1188 = dma.done.wait [#allocation3], 32  }
0x1907   :  { %1189 = vsyncadd [#allocation3], 4294967264 }
0x1908   :  { %1190 = dma.done.wait [#allocation5], 32  }
0x1909   :  { %1191 = vsyncadd [#allocation5], 4294967264 }
0x190a   :  { %960 = vsyncpa [#allocation3], 1 }
0x190b   :  { %961 = vsyncpa [#allocation5], 1 }

</bundles_post_ra>
